<compile_context>
chip_gen: v7x
topology: tpu7x:2x2x1
jax: 0.10.0
libtpu: 0.0.40
codegen_flags: <defaults>
</compile_context>

<pallas_src>
import functools

import jax
import jax.numpy as jnp
from jax import lax
from jax.experimental import pallas as pl
from jax.experimental.pallas import tpu as pltpu

EPS = 1e-5


def _dense_block_kernel(x_ref, w_ref, gamma_ref, beta_ref, o_ref, acc_ref, *, use_bf16):
    """One (feature-tile, K-tile) grid step.

    x_ref:     [B, tk]        activation K-slice
    w_ref:     [t_dout, tk]   weight tile in PyTorch [out, in] layout
    gamma_ref: [1, t_dout]    BN weight tile
    beta_ref:  [1, t_dout]    BN bias tile
    o_ref:     [B, t_dout]    output tile (resident across the K axis)
    acc_ref:   [B, t_dout]    f32 accumulator scratch
    """
    k = pl.program_id(1)

    @pl.when(k == 0)
    def _init():
        acc_ref[...] = jnp.zeros_like(acc_ref)

    x = x_ref[...]
    w = w_ref[...]
    if use_bf16:
        # v6e/v7x fast path: bf16 operands, f32 accumulation on the MXU.
        x = x.astype(jnp.bfloat16)
        w = w.astype(jnp.bfloat16)
    # x @ w.T without materializing a transposed weight: contract last axes.
    acc_ref[...] += lax.dot_general(
        x, w,
        dimension_numbers=(((1,), (1,)), ((), ())),
        preferred_element_type=jnp.float32,
    )

    @pl.when(k == pl.num_programs(1) - 1)
    def _finalize():
        y = acc_ref[...]                                        # [B, t_dout] f32
        # BatchNorm1d (training mode): per-feature batch mean / biased variance.
        # Linear bias intentionally omitted -- it is cancelled by the mean subtraction.
        mean = jnp.mean(y, axis=0, keepdims=True)               # [1, t_dout]
        var = jnp.mean((y - mean) * (y - mean), axis=0, keepdims=True)
        inv_std = lax.rsqrt(var + EPS)                          # EUP slot
        scale = gamma_ref[...] * inv_std                        # [1, t_dout]
        shift = beta_ref[...] - mean * scale                    # [1, t_dout]
        # Dropout(p=0.0) -> identity; Activation -> ReLU. Folded epilogue: mul+add+max.
        o_ref[...] = jnp.maximum(y * scale + shift, 0.0).astype(o_ref.dtype)


def dense_block(x, w, b, gamma, beta, *, t_dout=128, t_k=512, use_bf16_matmul=False):
    """Fused DenseBlock forward.

    x: [B, Din] f32; w: [Dout, Din] (PyTorch layout); b/gamma/beta: [Dout].
    `b` is accepted for API parity with nn.Linear(bias=True) but is unused:
    training-mode BatchNorm exactly cancels a per-feature bias.
    """
    del b  # algebraically cancelled by the BN mean subtraction
    B, Din = x.shape
    Dout = w.shape[0]

    # Lane-dense output / weight feature axis: pad Dout up to a multiple of t_dout (>=128).
    dout_p = t_dout * pl.cdiv(Dout, t_dout)
    # K tiling: tile only when Din is large; otherwise one full-width K block.
    if Din > t_k:
        tk = t_k
        din_p = t_k * pl.cdiv(Din, t_k)
    else:
        tk = Din
        din_p = Din

    # Zero padding is benign: padded K lanes contribute 0 to the matmul, and padded
    # feature lanes (gamma=beta=0) produce 0 outputs that are sliced away below.
    if din_p != Din:
        x = jnp.pad(x, ((0, 0), (0, din_p - Din)))
        w = jnp.pad(w, ((0, 0), (0, din_p - Din)))
    if dout_p != Dout:
        w = jnp.pad(w, ((0, dout_p - Dout), (0, 0)))
        gamma = jnp.pad(gamma, (0, dout_p - Dout))
        beta = jnp.pad(beta, (0, dout_p - Dout))

    g2 = gamma.reshape(1, dout_p)
    be2 = beta.reshape(1, dout_p)

    grid = (dout_p // t_dout, din_p // tk)   # (feature tiles, K tiles) -- reduction axis last

    out = pl.pallas_call(
        functools.partial(_dense_block_kernel, use_bf16=use_bf16_matmul),
        out_shape=jax.ShapeDtypeStruct((B, dout_p), jnp.float32),
        grid_spec=pltpu.PrefetchScalarGridSpec(
            num_scalar_prefetch=0,
            grid=grid,
            in_specs=[
                pl.BlockSpec((B, tk), lambda j, k: (0, k)),          # x
                pl.BlockSpec((t_dout, tk), lambda j, k: (j, k)),     # w (PyTorch layout)
                pl.BlockSpec((1, t_dout), lambda j, k: (0, j)),      # gamma
                pl.BlockSpec((1, t_dout), lambda j, k: (0, j)),      # beta
            ],
            out_specs=pl.BlockSpec((B, t_dout), lambda j, k: (0, j)),
            scratch_shapes=[pltpu.VMEM((B, t_dout), jnp.float32)],
        ),
        compiler_params=pltpu.CompilerParams(
            # feature tiles are independent -> shard across v7x's 2 TCs; K is a reduction.
            dimension_semantics=("parallel", "arbitrary"),
        ),
    )(x, w, g2, be2)

    return out[:, :Dout]


def dense_block_ref(x, w, b, gamma, beta):
    y = x @ w.T + b
    mean = y.mean(axis=0, keepdims=True)
    var = ((y - mean) ** 2).mean(axis=0, keepdims=True)
    y = (y - mean) / jnp.sqrt(var + EPS) * gamma + beta
    return jnp.maximum(y, 0.0)


def _make_inputs(key, B, Din, Dout):
    k_x, k_w, k_b, k_g, k_be = jax.random.split(key, 5)
    x = jax.random.normal(k_x, (B, Din), dtype=jnp.float32)
    w = 0.1 * jax.random.normal(k_w, (Dout, Din), dtype=jnp.float32)   # PyTorch [out, in]
    b = 0.1 * jax.random.normal(k_b, (Dout,), dtype=jnp.float32)
    gamma = 1.0 + 0.05 * jax.random.normal(k_g, (Dout,), dtype=jnp.float32)
    beta = 0.05 * jax.random.normal(k_be, (Dout,), dtype=jnp.float32)
    return x, w, b, gamma, beta


if __name__ == "__main__":
    key = jax.random.PRNGKey(0)
    k1, k2 = jax.random.split(key, 2)

    # Case 1: the original toy instance (single feature tile, single K tile).
    x, w, b, gamma, beta = _make_inputs(k1, B=8, Din=32, Dout=64)
    out = jax.block_until_ready(dense_block(x, w, b, gamma, beta))
    ref = dense_block_ref(x, w, b, gamma, beta)
    assert out.shape == (8, 64)
    assert jnp.allclose(out, ref, atol=1e-4, rtol=1e-4), "case1 f32 mismatch vs reference"

    # Case 2: exercises the grid (2 feature tiles x 2 K tiles), padding, and the
    # VMEM accumulator init/finalize path.
    x2, w2, b2, gamma2, beta2 = _make_inputs(k2, B=16, Din=160, Dout=192)
    out2 = jax.block_until_ready(dense_block(x2, w2, b2, gamma2, beta2, t_k=128))
    ref2 = dense_block_ref(x2, w2, b2, gamma2, beta2)
    assert out2.shape == (16, 192)
    assert jnp.allclose(out2, ref2, atol=1e-4, rtol=1e-4), "case2 f32 mismatch vs reference"

    # Case 3: bf16 matmul fast path (v6e/v7x), f32 accumulation + f32 BN epilogue.
    out3 = jax.block_until_ready(
        dense_block(x2, w2, b2, gamma2, beta2, t_k=128, use_bf16_matmul=True))
    assert jnp.allclose(out3, ref2, atol=5e-2, rtol=5e-2), "case3 bf16 mismatch vs reference"

    print("KERNEL_OK")
</pallas_src>

<mosaic_0001>
module attributes {stable_mosaic.version = 11 : i64} {
  func.func @_dense_block_kernel(%arg0: i32, %arg1: i32, %arg2: memref<8x32xf32, #tpu.memory_space<vmem>>, %arg3: memref<128x32xf32, #tpu.memory_space<vmem>>, %arg4: memref<1x128xf32, #tpu.memory_space<vmem>>, %arg5: memref<1x128xf32, #tpu.memory_space<vmem>>, %arg6: memref<8x128xf32, #tpu.memory_space<vmem>>, %arg7: memref<8x128xf32, #tpu.memory_space<vmem>>) attributes {dimension_semantics = [#tpu.dimension_semantics<parallel>, #tpu.dimension_semantics<arbitrary>], iteration_bounds = array<i64: 1, 1>, scalar_prefetch = 0 : i64, scratch_operands = 1 : i64, tpu.core_type = #tpu.core_type<tc>, window_params = [{transform_indices = @transform_0, window_bounds = array<i64: 8, 32>}, {transform_indices = @transform_1, window_bounds = array<i64: 128, 32>}, {transform_indices = @transform_2, window_bounds = array<i64: 1, 128>}, {transform_indices = @transform_3, window_bounds = array<i64: 1, 128>}, {transform_indices = @transform_4, window_bounds = array<i64: 8, 128>}]} {
    %c0_i32 = arith.constant 0 : i32
    %0 = arith.cmpi eq, %arg1, %c0_i32 : i32
    %1 = arith.extui %0 : i1 to i32
    %c0_i32_0 = arith.constant 0 : i32
    %2 = arith.cmpi ne, %1, %c0_i32_0 : i32
    scf.if %2 {
      %cst_10 = arith.constant 0.000000e+00 : f32
      %12 = vector.broadcast %cst_10 : f32 to vector<8x128xf32>
      %c0_11 = arith.constant 0 : index
      %c0_12 = arith.constant 0 : index
      %13 = vector.load %arg7[%c0_11, %c0_12] : memref<8x128xf32, #tpu.memory_space<vmem>>, vector<8x128xf32>
      tpu.vector_store %arg7[%c0_11, %c0_12], %12 {strides = array<i32>} : memref<8x128xf32, #tpu.memory_space<vmem>>, vector<8x128xf32>,
    } else {
    }
    %c0 = arith.constant 0 : index
    %c0_1 = arith.constant 0 : index
    %3 = vector.load %arg2[%c0, %c0_1] : memref<8x32xf32, #tpu.memory_space<vmem>>, vector<8x32xf32>
    %c0_2 = arith.constant 0 : index
    %c0_3 = arith.constant 0 : index
    %4 = vector.load %arg3[%c0_2, %c0_3] : memref<128x32xf32, #tpu.memory_space<vmem>>, vector<128x32xf32>
    %c0_4 = arith.constant 0 : index
    %c0_5 = arith.constant 0 : index
    %5 = vector.load %arg7[%c0_4, %c0_5] : memref<8x128xf32, #tpu.memory_space<vmem>>, vector<8x128xf32>
    %cst = arith.constant dense<0.000000e+00> : vector<8x128xf32>
    %6 = tpu.matmul %3, %4, %cst {dimension_numbers = #tpu.dot_dimension_numbers<[1], [1], [0], [0], [0, 0, 1, 0], [], []>} : vector<8x32xf32>, vector<128x32xf32>, vector<8x128xf32> -> vector<8x128xf32>
    %7 = arith.addf %5, %6 : vector<8x128xf32>
    %c0_6 = arith.constant 0 : index
    %c0_7 = arith.constant 0 : index
    %8 = vector.load %arg7[%c0_6, %c0_7] : memref<8x128xf32, #tpu.memory_space<vmem>>, vector<8x128xf32>
    tpu.vector_store %arg7[%c0_6, %c0_7], %7 {strides = array<i32>} : memref<8x128xf32, #tpu.memory_space<vmem>>, vector<8x128xf32>,
    %c0_i32_8 = arith.constant 0 : i32
    %9 = arith.cmpi eq, %arg1, %c0_i32_8 : i32
    %10 = arith.extui %9 : i1 to i32
    %c0_i32_9 = arith.constant 0 : i32
    %11 = arith.cmpi ne, %10, %c0_i32_9 : i32
    scf.if %11 {
      %c0_10 = arith.constant 0 : index
      %c0_11 = arith.constant 0 : index
      %12 = vector.load %arg7[%c0_10, %c0_11] : memref<8x128xf32, #tpu.memory_space<vmem>>, vector<8x128xf32>
      %cst_12 = arith.constant dense<0.000000e+00> : vector<128xf32>
      %13 = vector.multi_reduction <add>, %12, %cst_12 [0] : vector<8x128xf32> to vector<128xf32>
      %14 = vector.shape_cast %13 : vector<128xf32> to vector<1x128xf32>
      %cst_13 = arith.constant 8.000000e+00 : f32
      %15 = vector.broadcast %cst_13 : f32 to vector<1x128xf32>
      %16 = arith.divf %14, %15 : vector<1x128xf32>
      %17 = vector.broadcast %16 : vector<1x128xf32> to vector<8x128xf32>
      %18 = arith.subf %12, %17 : vector<8x128xf32>
      %19 = vector.broadcast %16 : vector<1x128xf32> to vector<8x128xf32>
      %20 = arith.subf %12, %19 : vector<8x128xf32>
      %21 = arith.mulf %18, %20 : vector<8x128xf32>
      %cst_14 = arith.constant dense<0.000000e+00> : vector<128xf32>
      %22 = vector.multi_reduction <add>, %21, %cst_14 [0] : vector<8x128xf32> to vector<128xf32>
      %23 = vector.shape_cast %22 : vector<128xf32> to vector<1x128xf32>
      %cst_15 = arith.constant 8.000000e+00 : f32
      %24 = vector.broadcast %cst_15 : f32 to vector<1x128xf32>
      %25 = arith.divf %23, %24 : vector<1x128xf32>
      %cst_16 = arith.constant 9.99999974E-6 : f32
      %26 = vector.broadcast %cst_16 : f32 to vector<1x128xf32>
      %27 = arith.addf %25, %26 : vector<1x128xf32>
      %28 = math.rsqrt %27 : vector<1x128xf32>
      %c0_17 = arith.constant 0 : index
      %c0_18 = arith.constant 0 : index
      %29 = vector.load %arg4[%c0_17, %c0_18] : memref<1x128xf32, #tpu.memory_space<vmem>>, vector<1x128xf32>
      %30 = arith.mulf %29, %28 : vector<1x128xf32>
      %c0_19 = arith.constant 0 : index
      %c0_20 = arith.constant 0 : index
      %31 = vector.load %arg5[%c0_19, %c0_20] : memref<1x128xf32, #tpu.memory_space<vmem>>, vector<1x128xf32>
      %32 = arith.mulf %16, %30 : vector<1x128xf32>
      %33 = arith.subf %31, %32 : vector<1x128xf32>
      %34 = vector.broadcast %30 : vector<1x128xf32> to vector<8x128xf32>
      %35 = arith.mulf %12, %34 : vector<8x128xf32>
      %36 = vector.broadcast %33 : vector<1x128xf32> to vector<8x128xf32>
      %37 = arith.addf %35, %36 : vector<8x128xf32>
      %cst_21 = arith.constant 0.000000e+00 : f32
      %38 = vector.broadcast %cst_21 : f32 to vector<8x128xf32>
      %39 = arith.maximumf %37, %38 : vector<8x128xf32>
      %c0_22 = arith.constant 0 : index
      %c0_23 = arith.constant 0 : index
      %40 = vector.load %arg6[%c0_22, %c0_23] : memref<8x128xf32, #tpu.memory_space<vmem>>, vector<8x128xf32>
      tpu.vector_store %arg6[%c0_22, %c0_23], %39 {strides = array<i32>} : memref<8x128xf32, #tpu.memory_space<vmem>>, vector<8x128xf32>,
    } else {
    }
    return
  }
  func.func @transform_0(%arg0: i32, %arg1: i32) -> (i32, i32) {
    %c0_i32 = arith.constant 0 : i32
    %c0_i32_0 = arith.constant 0 : i32
    return %c0_i32, %arg1 : i32, i32
  }
  func.func @transform_1(%arg0: i32, %arg1: i32) -> (i32, i32) {
    %c0_i32 = arith.constant 0 : i32
    return %arg0, %arg1 : i32, i32
  }
  func.func @transform_2(%arg0: i32, %arg1: i32) -> (i32, i32) {
    %c0_i32 = arith.constant 0 : i32
    %c0_i32_0 = arith.constant 0 : i32
    return %c0_i32, %arg0 : i32, i32
  }
  func.func @transform_3(%arg0: i32, %arg1: i32) -> (i32, i32) {
    %c0_i32 = arith.constant 0 : i32
    %c0_i32_0 = arith.constant 0 : i32
    return %c0_i32, %arg0 : i32, i32
  }
  func.func @transform_4(%arg0: i32, %arg1: i32) -> (i32, i32) {
    %c0_i32 = arith.constant 0 : i32
    %c0_i32_0 = arith.constant 0 : i32
    return %c0_i32, %arg0 : i32, i32
  }
}

</mosaic_0001>

<bundles_post_ra>
// kernel: tpu_custom_call.1
= control target key start
LH: loop header
LB: loop body
LE: loop exit
PB: predicated region body
PF: predicated region fallthrough
CT: control target
= control target key end

     0   :  { %vm41_vm0 = vcmask 261120   ;;  %v354_v2 = vmov 0.0|0.0   ;;  %vm355_vm2 = vmmov 0   ;;  %v356_v5 = vmov 0.0   ;;  %s475_s0 = inlined_call_operand.vmem [shape: f32[8,32], index: 0, kind: input, shape index: {}]   ;;  %s476_s1 = inlined_call_operand.vmem [shape: f32[128,32], index: 1, kind: input, shape index: {}]   ;;  %s477_s2 = inlined_call_operand.vmem [shape: f32[1,128], index: 2, kind: input, shape index: {}]   ;;  %s478_s3 = inlined_call_operand.vmem [shape: f32[1,128], index: 3, kind: input, shape index: {}]   ;;  %s479_s4 = inlined_call_operand.hbm [shape: f32[8,128], index: 4, kind: output, shape index: {}]  }
   0x1   :  { %v24_v0 = vld [vmem:[%s476_s1] sm:$0xff]  ;;  %v25_v1 = vld [vmem:[%s476_s1 + $0x8] sm:$0xff]  ;;  %292 = vmatprep.subr.bf16.mxu0 %v354_v2  ;;  %vm391_vm1 = vmpackc.low %vm41_vm0, %vm41_vm0  ;;  %289 = vmatprep.mubr.msk.f32.mxu0 %vm355_vm2, %v356_v5 }
   0x2   :  { %v293_v3 = vpack.c.bf16 %v25_v1, %v24_v0  ;;  %v26_v6 = vld [vmem:[%s476_s1 + $0x10] sm:$0xff]  ;;  %v27_v7 = vld [vmem:[%s476_s1 + $0x18] sm:$0xff] }
   0x4   :  { %295 = vmatpush3.bf16.xpose.msk.msra.mxu0 %vm391_vm1, %v293_v3 }
   0x5   :  { %296 = vmatprep.subr.bf16.mxu0 %v354_v2 }
   0x6   :  { %9 = vsyncpa [#allocation4], 0  ;;  %v297_v8 = vpack.c.bf16 %v27_v7, %v26_v6  ;;  %v28_v9 = vld [vmem:[%s476_s1 + $0x20] sm:$0xff]  ;;  %v29_v10 = vld [vmem:[%s476_s1 + $0x28] sm:$0xff]  ;;  %v194_v47 = vlaneseq  ;;  %s357_s25 = smov [#allocation3]  }
   0x7   :  { %v301_v11 = vpack.c.bf16 %v29_v10, %v28_v9  ;;  %v30_v12 = vld [vmem:[%s476_s1 + $0x30] sm:$0xff]  ;;  %v31_v13 = vld [vmem:[%s476_s1 + $0x38] sm:$0xff]  ;;  %v32_v15 = vld [vmem:[%s476_s1 + $0x40] sm:$0xff]  ;;  %s215_s26 = sshll.u32 %s357_s25, 4  ;;  %s216_s26 = int_to_ptr.vmem [resolvable:$true] %s215_s26 }
   0x8   :  { %v305_v14 = vpack.c.bf16 %v31_v13, %v30_v12  ;;  %v33_v16 = vld [vmem:[%s476_s1 + $0x48] sm:$0xff]  ;;  %v34_v18 = vld [vmem:[%s476_s1 + $0x50] sm:$0xff]  ;;  %v35_v19 = vld [vmem:[%s476_s1 + $0x58] sm:$0xff]  ;;  %v195_v48 = vshrl.u32 %v194_v47, 7  ;;  %s330_s27 = scalar_lea.vmem %s216_s26, 128  ;;  %p335_p1 = scmp.lt.s32.totalorder %s216_s26, %s216_s26 }
   0x9   :  { %v309_v17 = vpack.c.bf16 %v33_v16, %v32_v15  ;;  %v313_v20 = vpack.c.bf16 %v35_v19, %v34_v18  ;;  %v36_v21 = vld [vmem:[%s476_s1 + $0x60] sm:$0xff]  ;;  %v37_v22 = vld [vmem:[%s476_s1 + $0x68] sm:$0xff]  ;;  %v38_v24 = vld [vmem:[%s476_s1 + $0x70] sm:$0xff]  ;;  %p331_p0 = scmp.ne.s32.totalorder %s216_s26, %s330_s27  ;;  %p336_p2 = scmp.lt.s32.totalorder %s330_s27, %s330_s27 }
   0xa   :  { %v317_v23 = vpack.c.bf16 %v37_v22, %v36_v21  ;;  %v39_v25 = vld [vmem:[%s476_s1 + $0x78] sm:$0xff]  ;;  %v23_v27 = vld [vmem:[%s475_s0] sm:$0xff]  ;;  %v196_v50 = vsub.s32 0, %v195_v48 }
   0xb   :  { %v321_v26 = vpack.c.bf16 %v39_v25, %v38_v24  ;;  %v188_v49 = vld [vmem:[%s477_s2] sm:$0x1]  ;;  %p337_p3 = por %p336_p2, %p335_p1 }
   0xc   :  { %299 = vmatpush3.bf16.xpose.msk.msra.mxu0 %vm391_vm1, %v297_v8  ;;  %v190_v53 = vld [vmem:[%s478_s3] sm:$0x1] }
   0xd   :  { %300 = vmatprep.subr.bf16.mxu0 %v354_v2  ;;  %p338_p4 = pnand %p337_p3, %p331_p0 }
  0x14   :  { %303 = vmatpush3.bf16.xpose.msk.msra.mxu0 %vm391_vm1, %v301_v11 }
  0x15   :  { %304 = vmatprep.subr.bf16.mxu0 %v354_v2 }
  0x1c   :  { %307 = vmatpush3.bf16.xpose.msk.msra.mxu0 %vm391_vm1, %v305_v14 }
  0x1d   :  { %308 = vmatprep.subr.bf16.mxu0 %v354_v2 }
  0x24   :  { %311 = vmatpush3.bf16.xpose.msk.msra.mxu0 %vm391_vm1, %v309_v17 }
  0x25   :  { %312 = vmatprep.subr.bf16.mxu0 %v354_v2 }
  0x2c   :  { %315 = vmatpush3.bf16.xpose.msk.msra.mxu0 %vm391_vm1, %v313_v20 }
  0x2d   :  { %316 = vmatprep.subr.bf16.mxu0 %v354_v2 }
  0x34   :  { %319 = vmatpush3.bf16.xpose.msk.msra.mxu0 %vm391_vm1, %v317_v23 }
  0x35   :  { %320 = vmatprep.subr.bf16.mxu0 %v354_v2 }
  0x3c   :  { %323 = vmatpush3.bf16.xpose.msk.msra.mxu0 %vm391_vm1, %v321_v26 }
  0x43   :  { %290 = vmatmul.mubr.msk.f32.vlgmr.msra.gmra.mrb[0].mxu0 %vm41_vm0, %v23_v27 }
 0x116   :  { %v159_v28 = vpop.f32.mrb[0].mxu0 }
 0x117   :  { %v169_v29 = vrot.slane %v159_v28, 4  ;;  %v291_v30 = vpop.f32.mrb[1].mxu0 }
 0x119   :  { %v170_v31 = vadd.f32 %v169_v29, %v159_v28 }
 0x11b   :  { %v171_v32 = vrot.slane %v170_v31, 2 }
 0x11d   :  { %v172_v33 = vadd.f32 %v171_v32, %v170_v31 }
 0x11f   :  { %v173_v34 = vrot.slane %v172_v33, 1 }
 0x121   :  { %v174_v35 = vadd.f32 %v173_v34, %v172_v33 }
 0x123   :  { %v176_v36 = vmul.f32 0.125, %v174_v35 }
 0x125   :  { %v177_v37 = vsub.f32 %v159_v28, %v176_v36 }
 0x127   :  { %v178_v38 = vmul.f32 %v177_v37, %v177_v37 }
 0x129   :  { %v179_v39 = vrot.slane %v178_v38, 4 }
 0x12b   :  { %v180_v40 = vadd.f32 %v179_v39, %v178_v38 }
 0x12d   :  { %v181_v41 = vrot.slane %v180_v40, 2 }
 0x12f   :  { %v182_v42 = vadd.f32 %v181_v41, %v180_v40 }
 0x131   :  { %v183_v43 = vrot.slane %v182_v42, 1 }
 0x133   :  { %v184_v44 = vadd.f32 %v183_v43, %v182_v42 }
 0x135   :  { %v185_v45 = vmul.f32 0.125, %v184_v44 }
 0x137   :  { %v186_v46 = vadd.f32 1e-05, %v185_v45 }
 0x139   :  { %328 = vrsqrt.f32 %v186_v46 }
 0x143   :  { %v329_v51 = vpop.eup %328 }
 0x144   :  { %v189_v52 = vmul.f32 %v329_v51, %v188_v49 }
 0x146   :  { %v191_v54 = vmul.f32 %v189_v52, %v176_v36  ;;  %v197_v55 = vrot.slane %v189_v52, %v196_v50 }
 0x148   :  { %v192_v56 = vsub.f32 %v190_v53, %v191_v54  ;;  %v199_v57 = vmul.f32 %v197_v55, %v159_v28 }
 0x14a   :  { %v204_v58 = vrot.slane %v192_v56, %v196_v50 }
 0x14c   :  { %v206_v59 = vadd.f32 %v204_v58, %v199_v57 }
 0x14e   :  { %v207_v60 = vmax.f32 %v206_v59, 0.0 }
 0x150   :  { %208 = vst [vmem:[#allocation3] sm:$0xff] %v207_v60 }
 0x151   :  { %341 = shalt.err (!%p338_p4)
}
 0x152   :  { %s342_s28 = scalar_lea.hbm %s479_s4, 128 }
 0x153   :  { %p343_p5 = scmp.ne.s32.totalorder %s479_s4, %s342_s28  ;;  %p346_p6 = scmp.lt.u32.totalorder %s342_s28, %s479_s4 }
 0x155   :  { %p348_p7 = pnand %p346_p6, %p343_p5 }
 0x157   :  { %351 = shalt.err (!%p348_p7)
}
 0x158   :  { %218 = dma.vmem_to_hbm [thread:$0]  %s216_s26, 128, %s479_s4, [#allocation4]  }
 0x159   :  { %352 = dma.done.wait [#allocation4], 128  }
 0x15a   :  { %353 = vsyncadd [#allocation4], 4294967168 }
 0x15b   :  { %222 = vsyncpa [#allocation4], 1 }

</bundles_post_ra>
